<compile_context>
chip_gen: v5e
topology: v5e:2x2
jax: 0.10.0
libtpu: 0.0.40
codegen_flags: <defaults>
</compile_context>

<pallas_src>
import jax
import jax.numpy as jnp
from jax.experimental import pallas as pl
from jax.experimental.pallas import tpu as pltpu


# ----------------------------------------------------------------------------
# Pallas kernel: one grid step = one block of GB graphs (M = GB * padded_nodes rows).
#   H1 = relu(A_hat @ (X @ W1) + b1)          # GCNConv(input_dim -> hidden)
#   H2 = relu(A_hat @ (H1 @ W2) + b2)         # GCNConv(hidden -> hidden)
#   pooled = P @ H2                           # global_mean_pool (P rows carry 1/count)
#   out = pooled @ Wfc + bfc                  # nn.Linear(hidden -> output), lane-dense store
# ----------------------------------------------------------------------------
def gcn_kernel(a_ref, x_ref, w1_ref, w2_ref, wfc_ref, b12_ref, bfc_ref, p_ref, o_ref):
    a = a_ref[0]                      # (M, M) bf16, block-diag normalized adjacency
    b1 = b12_ref[0:1, :]              # (1, H)  f32
    b2 = b12_ref[1:2, :]              # (1, H)  f32
    bfc = bfc_ref[...]                # (1, OUT_PAD) f32

    # GCNConv 1: feature transform -> aggregate -> bias -> ReLU (f32 accumulation)
    xw = jnp.dot(x_ref[...], w1_ref[...], preferred_element_type=jnp.float32)
    h1 = jnp.dot(a, xw.astype(jnp.bfloat16), preferred_element_type=jnp.float32)
    h1 = jnp.maximum(h1 + b1, 0.0)

    # GCNConv 2
    hw = jnp.dot(h1.astype(jnp.bfloat16), w2_ref[...],
                 preferred_element_type=jnp.float32)
    h2 = jnp.dot(a, hw.astype(jnp.bfloat16), preferred_element_type=jnp.float32)
    h2 = jnp.maximum(h2 + b2, 0.0)

    # global_mean_pool as matmul with the per-graph averaging matrix (f32)
    pooled = jnp.dot(p_ref[0], h2, preferred_element_type=jnp.float32)   # (GB, H)

    # final Linear; (GB, 128) full-lane store
    o_ref[...] = jnp.dot(pooled.astype(jnp.bfloat16), wfc_ref[...],
                         preferred_element_type=jnp.float32) + bfc


def gcn_forward(a_blocks, x_flat, w1, w2, wfc, b12, bfc, pool_blocks):
    nb, m, _ = a_blocks.shape
    gb = pool_blocks.shape[1]
    fin = x_flat.shape[1]
    hidden = w2.shape[0]
    out_pad = wfc.shape[1]

    return pl.pallas_call(
        gcn_kernel,
        out_shape=jax.ShapeDtypeStruct((nb * gb, out_pad), jnp.float32),
        grid=(nb,),
        in_specs=[
            pl.BlockSpec((1, m, m), lambda g: (g, 0, 0)),       # block-diag A_hat (bf16)
            pl.BlockSpec((m, fin), lambda g: (g, 0)),           # node features (bf16)
            pl.BlockSpec((fin, hidden), lambda g: (0, 0)),      # W1 (bf16), resident
            pl.BlockSpec((hidden, hidden), lambda g: (0, 0)),   # W2 (bf16), resident
            pl.BlockSpec((hidden, out_pad), lambda g: (0, 0)),  # Wfc (bf16, lane-padded)
            pl.BlockSpec((2, hidden), lambda g: (0, 0)),        # b1/b2 slab (f32)
            pl.BlockSpec((1, out_pad), lambda g: (0, 0)),       # bfc (f32, lane-padded)
            pl.BlockSpec((1, gb, m), lambda g: (g, 0, 0)),      # mean-pool matrix (f32)
        ],
        out_specs=pl.BlockSpec((gb, out_pad), lambda g: (g, 0)),
        compiler_params=pltpu.CompilerParams(
            dimension_semantics=("parallel",),        # graph blocks are independent
            vmem_limit_bytes=32 * 1024 * 1024,
        ),
    )(a_blocks, x_flat, w1, w2, wfc, b12, bfc, pool_blocks)


# ----------------------------------------------------------------------------
# Glue (plain JAX, not hot path): normalized adjacency with self-loops,
# block-diagonal packing of GB graphs per MXU tile, mean-pool matrix.
# ----------------------------------------------------------------------------
def build_gcn_norm(edge_index, num_nodes, num_nodes_padded):
    src, dst = edge_index[0], edge_index[1]
    a = jnp.zeros((num_nodes, num_nodes), jnp.float32).at[dst, src].add(1.0)
    a = a + jnp.eye(num_nodes, dtype=jnp.float32)            # add self-loops
    deg = a.sum(axis=1)
    dinv = jax.lax.rsqrt(deg)
    a_hat = dinv[:, None] * a * dinv[None, :]                 # D^-1/2 (A+I) D^-1/2
    pad = num_nodes_padded - num_nodes
    return jnp.pad(a_hat, ((0, pad), (0, pad)))               # padded rows/cols are inert


def pack_block_diag(a_graphs, pool_graphs, nb, gb):
    g, np_, _ = a_graphs.shape
    eye = jnp.eye(gb, dtype=jnp.float32)
    a_bd = jnp.einsum('bgij,gh->bgihj',
                      a_graphs.reshape(nb, gb, np_, np_), eye).reshape(nb, gb * np_, gb * np_)
    p_bd = jnp.einsum('bgj,gh->bghj',
                      pool_graphs.reshape(nb, gb, np_), eye).reshape(nb, gb, gb * np_)
    return a_bd, p_bd


def reference_forward(a_bd, x_flat, w1, w2, wfc, b12, bfc, pool_bd):
    nb, m, _ = a_bd.shape
    b1, b2 = b12[0:1, :], b12[1:2, :]
    x = x_flat.reshape(nb, m, -1)

    def per_block(a, xb, p):
        xw = jnp.dot(xb, w1, preferred_element_type=jnp.float32)
        h1 = jnp.maximum(
            jnp.dot(a, xw.astype(jnp.bfloat16), preferred_element_type=jnp.float32) + b1, 0.0)
        hw = jnp.dot(h1.astype(jnp.bfloat16), w2, preferred_element_type=jnp.float32)
        h2 = jnp.maximum(
            jnp.dot(a, hw.astype(jnp.bfloat16), preferred_element_type=jnp.float32) + b2, 0.0)
        pooled = jnp.dot(p, h2, preferred_element_type=jnp.float32)
        return jnp.dot(pooled.astype(jnp.bfloat16), wfc,
                       preferred_element_type=jnp.float32) + bfc

    out = jax.vmap(per_block)(a_bd, x, pool_bd)               # (NB, GB, OUT_PAD)
    return out.reshape(-1, out.shape[-1])


if __name__ == "__main__":
    # Graph from the module: 9 nodes, 16 directed edges (shared topology here).
    edge_index = jnp.array(
        [[0, 1], [1, 2], [3, 4], [4, 5], [6, 7], [7, 8], [0, 3], [3, 6],
         [1, 4], [4, 7], [2, 5], [5, 8], [0, 4], [4, 8], [2, 4], [4, 6]],
        dtype=jnp.int32).T                                     # [2, 16]

    NUM_NODES = 9
    NODES_PAD = 16                 # pad nodes to a multiple of 8 sublanes
    IN_DIM, HIDDEN, OUT_DIM = 4, 32, 8
    OUT_PAD = 128                  # lane-dense output store
    NUM_GRAPHS = 32                # graphs batched into one pallas_call
    GB = 8                         # graphs per grid step -> M = 128 rows per MXU tile
    NB = NUM_GRAPHS // GB
    M = GB * NODES_PAD

    key = jax.random.PRNGKey(0)
    k = jax.random.split(key, 8)

    node_valid = (jnp.arange(NODES_PAD) < NUM_NODES).astype(jnp.float32)
    x = jax.random.normal(k[0], (NUM_GRAPHS, NODES_PAD, IN_DIM), jnp.float32)
    x = x * node_valid[None, :, None]                          # padded node rows inert

    # deterministic synthetic parameters (glorot-ish scaling)
    w1 = jax.random.normal(k[1], (IN_DIM, HIDDEN), jnp.float32) * 0.3
    b1 = jax.random.normal(k[2], (HIDDEN,), jnp.float32) * 0.1
    w2 = jax.random.normal(k[3], (HIDDEN, HIDDEN), jnp.float32) * 0.15
    b2 = jax.random.normal(k[4], (HIDDEN,), jnp.float32) * 0.1
    wfc = jax.random.normal(k[5], (HIDDEN, OUT_DIM), jnp.float32) * 0.15
    bfc = jax.random.normal(k[6], (OUT_DIM,), jnp.float32) * 0.1

    # lane-pad the classifier head (zero columns are inert, sliced off below)
    wfc_p = jnp.pad(wfc, ((0, 0), (0, OUT_PAD - OUT_DIM)))
    bfc_p = jnp.pad(bfc, ((0, OUT_PAD - OUT_DIM),))[None, :]   # (1, 128)
    b12 = jnp.stack([b1, b2], axis=0)                          # (2, 32)

    # normalized adjacency + mean-pool weights, then block-diagonal packing
    a_one = build_gcn_norm(edge_index, NUM_NODES, NODES_PAD)   # [16, 16]
    a_graphs = jnp.broadcast_to(a_one, (NUM_GRAPHS, NODES_PAD, NODES_PAD))
    pool_graphs = jnp.broadcast_to(node_valid / NUM_NODES, (NUM_GRAPHS, NODES_PAD))
    a_bd, pool_bd = pack_block_diag(a_graphs, pool_graphs, NB, GB)   # [NB,128,128], [NB,8,128]

    # bf16 MXU operands (f32 accumulation inside the kernel)
    a_bd_bf = a_bd.astype(jnp.bfloat16)
    x_flat_bf = x.reshape(NUM_GRAPHS * NODES_PAD, IN_DIM).astype(jnp.bfloat16)
    w1_bf = w1.astype(jnp.bfloat16)
    w2_bf = w2.astype(jnp.bfloat16)
    wfc_bf = wfc_p.astype(jnp.bfloat16)

    out_padded = gcn_forward(a_bd_bf, x_flat_bf, w1_bf, w2_bf, wfc_bf,
                             b12, bfc_p, pool_bd)
    out_padded = jax.block_until_ready(out_padded)
    out = out_padded[:, :OUT_DIM]                              # [NUM_GRAPHS, 8]

    ref = reference_forward(a_bd_bf, x_flat_bf, w1_bf, w2_bf, wfc_bf,
                            b12, bfc_p, pool_bd)[:, :OUT_DIM]
    assert out.shape == (NUM_GRAPHS, OUT_DIM)
    assert jnp.allclose(out, ref, atol=1e-2, rtol=1e-2), "mismatch vs JAX reference"

    print("KERNEL_OK")
</pallas_src>

<mosaic_0001>
module attributes {stable_mosaic.version = 11 : i64} {
  func.func @gcn_kernel(%arg0: i32, %arg1: memref<1x128x128xbf16, #tpu.memory_space<vmem>>, %arg2: memref<128x4xbf16, #tpu.memory_space<vmem>>, %arg3: memref<4x32xbf16, #tpu.memory_space<vmem>>, %arg4: memref<32x32xbf16, #tpu.memory_space<vmem>>, %arg5: memref<32x128xbf16, #tpu.memory_space<vmem>>, %arg6: memref<2x32xf32, #tpu.memory_space<vmem>>, %arg7: memref<1x128xf32, #tpu.memory_space<vmem>>, %arg8: memref<1x8x128xf32, #tpu.memory_space<vmem>>, %arg9: memref<8x128xf32, #tpu.memory_space<vmem>>) attributes {dimension_semantics = [#tpu.dimension_semantics<parallel>], iteration_bounds = array<i64: 4>, scalar_prefetch = 0 : i64, scratch_operands = 0 : i64, tpu.core_type = #tpu.core_type<tc>, window_params = [{transform_indices = @transform_0, window_bounds = array<i64: 1, 128, 128>}, {transform_indices = @transform_1, window_bounds = array<i64: 128, 4>}, {pipeline_mode = #tpu.pipeline_mode<synchronous>, transform_indices = @transform_2, window_bounds = array<i64: 4, 32>}, {pipeline_mode = #tpu.pipeline_mode<synchronous>, transform_indices = @transform_3, window_bounds = array<i64: 32, 32>}, {pipeline_mode = #tpu.pipeline_mode<synchronous>, transform_indices = @transform_4, window_bounds = array<i64: 32, 128>}, {pipeline_mode = #tpu.pipeline_mode<synchronous>, transform_indices = @transform_5, window_bounds = array<i64: 2, 32>}, {pipeline_mode = #tpu.pipeline_mode<synchronous>, transform_indices = @transform_6, window_bounds = array<i64: 1, 128>}, {transform_indices = @transform_7, window_bounds = array<i64: 1, 8, 128>}, {transform_indices = @transform_8, window_bounds = array<i64: 8, 128>}]} {
    %c0 = arith.constant 0 : index
    %c0_0 = arith.constant 0 : index
    %c0_1 = arith.constant 0 : index
    %0 = vector.load %arg1[%c0, %c0_0, %c0_1] : memref<1x128x128xbf16, #tpu.memory_space<vmem>>, vector<1x128x128xbf16>
    %1 = vector.shape_cast %0 : vector<1x128x128xbf16> to vector<128x128xbf16>
    %c0_2 = arith.constant 0 : index
    %c0_3 = arith.constant 0 : index
    %2 = vector.load %arg6[%c0_2, %c0_3] : memref<2x32xf32, #tpu.memory_space<vmem>>, vector<1x32xf32>
    %c1 = arith.constant 1 : index
    %c0_4 = arith.constant 0 : index
    %3 = vector.load %arg6[%c1, %c0_4] : memref<2x32xf32, #tpu.memory_space<vmem>>, vector<1x32xf32>
    %c0_5 = arith.constant 0 : index
    %c0_6 = arith.constant 0 : index
    %4 = vector.load %arg7[%c0_5, %c0_6] : memref<1x128xf32, #tpu.memory_space<vmem>>, vector<1x128xf32>
    %c0_7 = arith.constant 0 : index
    %c0_8 = arith.constant 0 : index
    %5 = vector.load %arg2[%c0_7, %c0_8] : memref<128x4xbf16, #tpu.memory_space<vmem>>, vector<128x4xbf16>
    %c0_9 = arith.constant 0 : index
    %c0_10 = arith.constant 0 : index
    %6 = vector.load %arg3[%c0_9, %c0_10] : memref<4x32xbf16, #tpu.memory_space<vmem>>, vector<4x32xbf16>
    %cst = arith.constant dense<0.000000e+00> : vector<128x32xf32>
    %7 = tpu.matmul %5, %6, %cst {dimension_numbers = #tpu.dot_dimension_numbers<[1], [0], [0], [1], [0, 0, 1, 1], [], []>} : vector<128x4xbf16>, vector<4x32xbf16>, vector<128x32xf32> -> vector<128x32xf32>
    %8 = arith.truncf %7 : vector<128x32xf32> to vector<128x32xbf16>
    %cst_11 = arith.constant dense<0.000000e+00> : vector<128x32xf32>
    %9 = tpu.matmul %1, %8, %cst_11 {dimension_numbers = #tpu.dot_dimension_numbers<[1], [0], [0], [1], [0, 0, 1, 1], [], []>} : vector<128x128xbf16>, vector<128x32xbf16>, vector<128x32xf32> -> vector<128x32xf32>
    %10 = vector.broadcast %2 : vector<1x32xf32> to vector<128x32xf32>
    %11 = arith.addf %9, %10 : vector<128x32xf32>
    %cst_12 = arith.constant 0.000000e+00 : f32
    %12 = vector.broadcast %cst_12 : f32 to vector<128x32xf32>
    %13 = arith.maximumf %11, %12 : vector<128x32xf32>
    %14 = arith.truncf %13 : vector<128x32xf32> to vector<128x32xbf16>
    %c0_13 = arith.constant 0 : index
    %c0_14 = arith.constant 0 : index
    %15 = vector.load %arg4[%c0_13, %c0_14] : memref<32x32xbf16, #tpu.memory_space<vmem>>, vector<32x32xbf16>
    %cst_15 = arith.constant dense<0.000000e+00> : vector<128x32xf32>
    %16 = tpu.matmul %14, %15, %cst_15 {dimension_numbers = #tpu.dot_dimension_numbers<[1], [0], [0], [1], [0, 0, 1, 1], [], []>} : vector<128x32xbf16>, vector<32x32xbf16>, vector<128x32xf32> -> vector<128x32xf32>
    %17 = arith.truncf %16 : vector<128x32xf32> to vector<128x32xbf16>
    %cst_16 = arith.constant dense<0.000000e+00> : vector<128x32xf32>
    %18 = tpu.matmul %1, %17, %cst_16 {dimension_numbers = #tpu.dot_dimension_numbers<[1], [0], [0], [1], [0, 0, 1, 1], [], []>} : vector<128x128xbf16>, vector<128x32xbf16>, vector<128x32xf32> -> vector<128x32xf32>
    %19 = vector.broadcast %3 : vector<1x32xf32> to vector<128x32xf32>
    %20 = arith.addf %18, %19 : vector<128x32xf32>
    %cst_17 = arith.constant 0.000000e+00 : f32
    %21 = vector.broadcast %cst_17 : f32 to vector<128x32xf32>
    %22 = arith.maximumf %20, %21 : vector<128x32xf32>
    %c0_18 = arith.constant 0 : index
    %c0_19 = arith.constant 0 : index
    %c0_20 = arith.constant 0 : index
    %23 = vector.load %arg8[%c0_18, %c0_19, %c0_20] : memref<1x8x128xf32, #tpu.memory_space<vmem>>, vector<1x8x128xf32>
    %24 = vector.shape_cast %23 : vector<1x8x128xf32> to vector<8x128xf32>
    %cst_21 = arith.constant dense<0.000000e+00> : vector<8x32xf32>
    %25 = tpu.matmul %24, %22, %cst_21 {dimension_numbers = #tpu.dot_dimension_numbers<[1], [0], [0], [1], [0, 0, 1, 1], [], []>} : vector<8x128xf32>, vector<128x32xf32>, vector<8x32xf32> -> vector<8x32xf32>
    %26 = arith.truncf %25 : vector<8x32xf32> to vector<8x32xbf16>
    %c0_22 = arith.constant 0 : index
    %c0_23 = arith.constant 0 : index
    %27 = vector.load %arg5[%c0_22, %c0_23] : memref<32x128xbf16, #tpu.memory_space<vmem>>, vector<32x128xbf16>
    %cst_24 = arith.constant dense<0.000000e+00> : vector<8x128xf32>
    %28 = tpu.matmul %26, %27, %cst_24 {dimension_numbers = #tpu.dot_dimension_numbers<[1], [0], [0], [1], [0, 0, 1, 1], [], []>} : vector<8x32xbf16>, vector<32x128xbf16>, vector<8x128xf32> -> vector<8x128xf32>
    %29 = vector.broadcast %4 : vector<1x128xf32> to vector<8x128xf32>
    %30 = arith.addf %28, %29 : vector<8x128xf32>
    %c0_25 = arith.constant 0 : index
    %c0_26 = arith.constant 0 : index
    %31 = vector.load %arg9[%c0_25, %c0_26] : memref<8x128xf32, #tpu.memory_space<vmem>>, vector<8x128xf32>
    tpu.vector_store %arg9[%c0_25, %c0_26], %30 {strides = array<i32>} : memref<8x128xf32, #tpu.memory_space<vmem>>, vector<8x128xf32>,
    return
  }
  func.func @transform_0(%arg0: i32) -> (i32, i32, i32) {
    %c0_i32 = arith.constant 0 : i32
    %c0_i32_0 = arith.constant 0 : i32
    %c0_i32_1 = arith.constant 0 : i32
    return %arg0, %c0_i32, %c0_i32_0 : i32, i32, i32
  }
  func.func @transform_1(%arg0: i32) -> (i32, i32) {
    %c0_i32 = arith.constant 0 : i32
    %c0_i32_0 = arith.constant 0 : i32
    return %arg0, %c0_i32 : i32, i32
  }
  func.func @transform_2(%arg0: i32) -> (i32, i32) {
    %c0_i32 = arith.constant 0 : i32
    %c0_i32_0 = arith.constant 0 : i32
    %c0_i32_1 = arith.constant 0 : i32
    return %c0_i32, %c0_i32_0 : i32, i32
  }
  func.func @transform_3(%arg0: i32) -> (i32, i32) {
    %c0_i32 = arith.constant 0 : i32
    %c0_i32_0 = arith.constant 0 : i32
    %c0_i32_1 = arith.constant 0 : i32
    return %c0_i32, %c0_i32_0 : i32, i32
  }
  func.func @transform_4(%arg0: i32) -> (i32, i32) {
    %c0_i32 = arith.constant 0 : i32
    %c0_i32_0 = arith.constant 0 : i32
    %c0_i32_1 = arith.constant 0 : i32
    return %c0_i32, %c0_i32_0 : i32, i32
  }
  func.func @transform_5(%arg0: i32) -> (i32, i32) {
    %c0_i32 = arith.constant 0 : i32
    %c0_i32_0 = arith.constant 0 : i32
    %c0_i32_1 = arith.constant 0 : i32
    return %c0_i32, %c0_i32_0 : i32, i32
  }
  func.func @transform_6(%arg0: i32) -> (i32, i32) {
    %c0_i32 = arith.constant 0 : i32
    %c0_i32_0 = arith.constant 0 : i32
    %c0_i32_1 = arith.constant 0 : i32
    return %c0_i32, %c0_i32_0 : i32, i32
  }
  func.func @transform_7(%arg0: i32) -> (i32, i32, i32) {
    %c0_i32 = arith.constant 0 : i32
    %c0_i32_0 = arith.constant 0 : i32
    %c0_i32_1 = arith.constant 0 : i32
    return %arg0, %c0_i32, %c0_i32_0 : i32, i32, i32
  }
  func.func @transform_8(%arg0: i32) -> (i32, i32) {
    %c0_i32 = arith.constant 0 : i32
    %c0_i32_0 = arith.constant 0 : i32
    return %arg0, %c0_i32 : i32, i32
  }
}

</mosaic_0001>

<bundles_post_ra>
// kernel: tpu_custom_call.1
= control target key start
LH: loop header
LB: loop body
LE: loop exit
PB: predicated region body
PF: predicated region fallthrough
CT: control target
= control target key end

     0   :  { %s1675_s0 = inlined_call_operand.vmem [shape: bf16[4,128,128], index: 0, kind: input, shape index: {}]   ;;  %s1676_s1 = inlined_call_operand.vmem [shape: bf16[512,4], index: 1, kind: input, shape index: {}]   ;;  %s1677_s2 = inlined_call_operand.vmem [shape: bf16[4,32], index: 2, kind: input, shape index: {}]   ;;  %s1678_s3 = inlined_call_operand.hbm [shape: bf16[32,32], index: 3, kind: input, shape index: {}]   ;;  %s1679_s4 = inlined_call_operand.hbm [shape: bf16[32,128], index: 4, kind: input, shape index: {}]   ;;  %s1680_s5 = inlined_call_operand.vmem [shape: f32[2,32], index: 5, kind: input, shape index: {}]   ;;  %s1681_s6 = inlined_call_operand.vmem [shape: f32[1,128], index: 6, kind: input, shape index: {}]   ;;  %s1682_s7 = inlined_call_operand.hbm [shape: f32[4,8,128], index: 7, kind: input, shape index: {}]   ;;  %s1683_s8 = inlined_call_operand.hbm [shape: f32[32,128], index: 8, kind: output, shape index: {}]  }
   0x1   :  { %1684 = sst [smem:[#allocation14_spill]] %s1678_s3 }
   0x2   :  { %1685 = sst [smem:[#allocation15_spill]] %s1679_s4 }
   0x3   :  { %13 = vsyncpa [#allocation3], 0 }
   0x4   :  { %14 = vsyncpa [#allocation6], 0 }
   0x5   :  { %15 = vsyncpa [#allocation4], 0 }
   0x6   :  { %17 = vsyncpa [#allocation4 + $0x1], 0  ;;  %s1457_s27 = smov 0   ;;  %s1459_s28 = smov 0  }
   0x7   :  { %s1461_s29 = smov 0   ;;  %s1463_s30 = smov 0  }
   0x8 LB: > { %s1686_s3 = sld [smem:[#allocation14_spill]]  ;;  %s1481_s12 = sadd.s32 4294967295, %s1406_s30   ;;  %s1406_s30 = sphi %s1463_s30, %s1699_s30   ;;  %s1402_s29 = sphi %s1461_s29, %s1698_s29   ;;  %s1398_s28 = sphi %s1459_s28, %s1697_s28   ;;  %s1394_s27 = sphi %s1457_s27, %s1696_s27  }
   0x9   : > { %p1033_p0 = scmp.ge.s32.totalorder %s1406_s30, 1  ;;  %p201_p1 = scmp.eq.s32.totalorder %s1481_s12, 0 }
   0xa   : > { %p224_p2 = scmp.eq.s32.totalorder %s1481_s12, 3  ;;  %p237_p3 = scmp.lt.s32.totalorder %s1406_s30, 5 }
   0xb   : > { %s1408_s14 = smov [#allocation2]   ;;  %s1688_s4 = sld [smem:[#allocation15_spill]] }
   0xc   : > { %p1487_p4 = pnand %p1033_p0, %p237_p3  ;;  %s253_s15 = sshll.u32 %s1408_s14, 4  ;;  %s254_s15 = int_to_ptr.vmem [resolvable:$true] %s253_s15 }
   0xd   : > { %s1409_s19 = smov [#allocation5]   ;;  %s1410_s21 = smov 64  }
   0xe   : > { %s251_s11 = sshll.u32 %s1686_s3, 4  ;;  %p1182_p5 = pneg %p1487_p4  ;;  %s252_s11 = int_to_ptr.hbm [resolvable:$true] %s251_s11 }
   0xf   : > { %s267_s20 = sshll.u32 %s1409_s19, 4  ;;  %s1411_s22 = smov 4   ;;  %s268_s20 = int_to_ptr.vmem [resolvable:$true] %s267_s20 }
  0x10   : > { %p1183_p6 = pnand %p1182_p5, %p201_p1  ;;  %s1032_s23 = sadd.s32 4294967294, %s1406_s30  }
  0x11   : > { %s265_s18 = sshll.u32 %s1688_s4, 4  ;;  %s1500_s24 = sadd.s32 1, %s1406_s30   ;;  %s266_s18 = int_to_ptr.hbm [resolvable:$true] %s265_s18 }
  0x12   : > { %1185 = dma.hbm_to_vmem [thread:$0]  (!%p1183_p6), %s252_s11, 256, %s254_s15, [#allocation3], %s1410_s21, %s1410_s21, %s1411_s22  }
  0x13   : > { %1188 = dma.hbm_to_vmem [thread:$0]  (!%p1183_p6), %s266_s18, 256, %s268_s20, [#allocation6], %s1410_s21, %s1410_s21, %s1411_s22  }
  0x14   : > { %s187_s25 = sadd.s32 1, %s1402_s29  ;;  %s184_s26 = ssub.s32 %s1406_s30, %s1500_s24 }
  0x15   : > { %p194_p7 = scmp.ne.s32.totalorder %s1402_s29, %s1398_s28  ;;  %p185_p8 = scmp.eq.s32.totalorder %s184_s26, 0 }
  0x16   : > { %p195_p9 = scmp.eq.s32.totalorder %s1406_s30, 0  ;;  %p200_p10 = scmp.ne.s32.totalorder %s1398_s28, %s1394_s27 }
  0x17   : > { %p1512_p11 = por %p224_p2, %p194_p7  ;;  %p230_p0 = scmp.eq.s32.totalorder %s1032_s23, 3 }
  0x18   : > { %s1517_s10 = scalar_select %p185_p8, %s1402_s29, %s187_s25  }
  0x19   : > { %p1521_p12 = por %p201_p1, %p200_p10  ;;  %p1525_p13 = por %p195_p9, %p194_p7 }
  0x1a   : > { %1690 = sst [smem:[#allocation13_spill]] %s1517_s10  ;;  %p1199_p3 = scmp.lt.s32.totalorder %s1406_s30, 4 }
  0x1b   : > { %s306_s15 = sand.u32 1, %s1402_s29   ;;  %p1531_p5 = por %p230_p0, %p200_p10 }
  0x1c   : > { %s304_s17 = sand.u32 1, %s1406_s30   ;;  %s1037_s18 = sshll.u32 %s306_s15, 3 }
  0x1d   : > { %s1038_s19 = sshll.u32 %s1406_s30, 3  ;;  %s308_s26 = scalar_lea.vmem [#allocation7], %s1037_s18 }
  0x1e   : > { %s312_s22 = scalar_lea.hbm %s1682_s7, %s1038_s19  ;;  %s316_s3 = sshll.u32 %s308_s26, 4  ;;  %s317_s3 = int_to_ptr.vmem [resolvable:$true] %s316_s3 }
  0x1f   : > { %s314_s25 = sshll.u32 %s312_s22, 4  ;;  %p1542_p2 = pnand %p1199_p3, %p1525_p13  ;;  %s315_s25 = int_to_ptr.hbm [resolvable:$true] %s314_s25 }
  0x20   : > { %s305_s4 = scalar_lea.sflag [#allocation3], %s304_s17  ;;  %s1302_s10 = sshra.s32 %s315_s25, 4  ;;  %s1303_s10 = int_to_ptr.hbm [resolvable:$true] %s1302_s10 }
  0x21   : > { %s1304_s15 = scalar_lea.hbm %s1303_s10, 8  ;;  %p1306_p7 = pneg %p1542_p2 }
  0x22   : > { %p1305_p6 = scmp.ne.s32.totalorder %s1303_s10, %s1304_s15  ;;  %s1309_s20 = scalar_lea.hbm %s1682_s7, 32 }
  0x23   : > { %p1310_p10 = scmp.lt.s32.totalorder %s1303_s10, %s1682_s7  ;;  %p1311_p13 = scmp.lt.s32.totalorder %s1309_s20, %s1304_s15 }
  0x24   : > { %p1307_p8 = pnand %p1306_p7, %p1305_p6 }
  0x25   : > { %p1312_p0 = por %p1311_p13, %p1310_p10 }
  0x26   : > { %p1308_p9 = pneg %p1307_p8 }
  0x28   : > { %p1313_p3 = pnand %p1312_p0, %p1308_p9 }
  0x2a   : > { %1316 = shalt.err (!%p1313_p3)
}
  0x2b   : > { %1192 = dma.hbm_to_vmem [thread:$0]  (!%p1542_p2), %s315_s25, 128, %s317_s3, %s305_s4  }
  0x2c   : > { %325 = sbr.rel (%p1487_p4) target bundleno = 1322 (0x52a), region = 52 }
  0x31   : > { %1377 = dma.done.wait (%p201_p1), [#allocation3], 256  }
  0x32   : > { %1379 = vsyncadd (%p201_p1), [#allocation3], 4294967040 }
  0x33   : > { %1381 = dma.done.wait (%p201_p1), [#allocation6], 256  }
  0x34   : > { %1383 = vsyncadd (%p201_p1), [#allocation6], 4294967040  ;;  %s337_s3 = sand.u32 1, %s1481_s12   ;;  %s339_s4 = sand.u32 1, %s1398_s28  }
  0x35   : > { %s1570_s13 = sshll.u32 %s339_s4, 3  ;;  %s338_s10 = scalar_lea.sflag [#allocation3], %s337_s3 }
  0x36   : > { %s341_s17 = scalar_lea.vmem [#allocation7], %s1570_s13 }
  0x37   : > { %1385 = dma.done.wait (%p1521_p12), %s338_s10, 128  }
  0x38   : > { %1387 = vsyncadd (%p1521_p12), %s338_s10, 4294967168  ;;  %s1046_s22 = sshll.u32 %s1481_s12, 4  ;;  %vm498_vm0 = vcmask 1041408   ;;  %v432_v0 = vld [vmem:[%s1677_s2] sm:$0x3]  ;;  %vm473_vm1 = vcmask 31744  }
  0x39   : > { %p391_p1 = scmp.lt.s32.totalorder %s1046_s22, 63  ;;  %v500_v1 = vsel %vm498_vm0, %v432_v0, 0  ;;  %p385_p4 = scmp.lt.s32.totalorder %s1481_s12, 3  ;;  %v1167_v41 = vld [vmem:[#allocation2 + $0x8] sm:$0xff]  ;;  %v1166_v42 = vld [vmem:[#allocation2] sm:$0xff]  ;;  %vm697_vm2 = vcmask 261120  }
  0x3a   : > { %509 = vmatpush.bf16.msra.mxu0 %v500_v1  ;;  %728 = vmatpush.bf16.msra.mxu2 %v1167_v41  ;;  %v1239_v45 = vld [vmem:[%s1680_s5] ss:$0 sm:$0xff]  ;;  %s1146_s23 = sshll.u32 %s1481_s12, 3  ;;  %s384_s21 = scalar_lea.vmem [#allocation8], %s1570_s13 }
  0x3b   : > { %s1701_s22 = smov (!%p391_p1, %s1046_s22), 63  ;;  %s914_s18 = scalar_lea.hbm %s1683_s8, %s1146_s23 }
  0x3c   : > { %s1047_s25 = sshll.u32 %s1701_s22, 2  ;;  %s916_s14 = sshll.u32 %s384_s21, 4  ;;  %s917_s14 = int_to_ptr.vmem [resolvable:$true] %s916_s14 }
  0x3d   : > { %s394_s15 = scalar_lea.vmem %s1676_s1, %s1047_s25  ;;  %s1352_s13 = scalar_lea.hbm %s1683_s8, 32 }
  0x3e   : > { %v1158_v2 = vld [vmem:[%s394_s15] sm:$0xff]  ;;  %v1159_v3 = vld [vmem:[%s394_s15 + $0x8] sm:$0xff]  ;;  %v1160_v4 = vld [vmem:[%s394_s15 + $0x10] sm:$0xff]  ;;  %s386_s11 = scalar_select %p385_p4, %s1481_s12, 3  ;;  %729 = vmatpush.bf16.msra.mxu2 %v1166_v42 }
  0x3f   : > { %1080 = vmatmul.msk.bf16.vlgmr.msra.gmra.mxu0 %vm473_vm1, %v1158_v2  ;;  %v1161_v5 = vld [vmem:[%s394_s15 + $0x18] sm:$0xff]  ;;  %v1162_v6 = vld [vmem:[%s394_s15 + $0x20] sm:$0xff]  ;;  %v1163_v7 = vld [vmem:[%s394_s15 + $0x28] sm:$0xff] }
  0x40   : > { %v1164_v8 = vld [vmem:[%s394_s15 + $0x30] sm:$0xff]  ;;  %v1165_v9 = vld [vmem:[%s394_s15 + $0x38] sm:$0xff]  ;;  %s1149_s20 = sshll.u32 %s386_s11, 6 }
  0x41   : > { %s389_s3 = scalar_lea.vmem %s1675_s0, %s1149_s20 }
  0x42   : > { %v1589_v34 = vld [vmem:[%s389_s3] sm:$0xff]  ;;  %v1592_v35 = vld [vmem:[%s389_s3 + $0x8] sm:$0xff]  ;;  %v1595_v36 = vld [vmem:[%s389_s3 + $0x10] sm:$0xff] }
  0x43   : > { %v1598_v37 = vld [vmem:[%s389_s3 + $0x18] sm:$0xff]  ;;  %v1601_v38 = vld [vmem:[%s389_s3 + $0x20] sm:$0xff]  ;;  %v1604_v39 = vld [vmem:[%s389_s3 + $0x28] sm:$0xff] }
  0x44   : > { %v1607_v40 = vld [vmem:[%s389_s3 + $0x30] sm:$0xff]  ;;  %v1610_v43 = vld [vmem:[%s389_s3 + $0x38] sm:$0xff]  ;;  %s904_s3 = scalar_lea.sflag [#allocation4], %s339_s4 }
  0x4f   : > { %1081 = vmatmul.msk.bf16.gmra.mxu0 %vm473_vm1, %v1159_v3 }
  0x5f   : > { %1082 = vmatmul.msk.bf16.gmra.mxu0 %vm473_vm1, %v1160_v4 }
  0x6f   : > { %1083 = vmatmul.msk.bf16.gmra.mxu0 %vm473_vm1, %v1161_v5 }
  0x7f   : > { %1084 = vmatmul.msk.bf16.gmra.mxu0 %vm473_vm1, %v1162_v6 }
  0x8f   : > { %1085 = vmatmul.msk.bf16.gmra.mxu0 %vm473_vm1, %v1163_v7 }
  0x9f   : > { %1086 = vmatmul.msk.bf16.gmra.mxu0 %vm473_vm1, %v1164_v8 }
  0xaf   : > { %1087 = vmatmul.msk.bf16.gmra.mxu0 %vm473_vm1, %v1165_v9 }
  0xbc   : > { %v511_v10 = vpop.f32.mrf.mxu0 }
  0xc4   : > { %v513_v11 = vpop.f32.mrf.mxu0 }
  0xc5   : > { %v551_v12 = vpack.c.bf16 %v513_v11, %v511_v10 }
  0xcc   : > { %v516_v13 = vpop.f32.mrf.mxu0 }
  0xd4   : > { %v518_v14 = vpop.f32.mrf.mxu0 }
  0xd5   : > { %v552_v15 = vpack.c.bf16 %v518_v14, %v516_v13 }
  0xdc   : > { %v521_v16 = vpop.f32.mrf.mxu0 }
  0xe4   : > { %v523_v17 = vpop.f32.mrf.mxu0 }
  0xe5   : > { %v553_v18 = vpack.c.bf16 %v523_v17, %v521_v16 }
  0xec   : > { %v526_v19 = vpop.f32.mrf.mxu0 }
  0xf4   : > { %v528_v20 = vpop.f32.mrf.mxu0 }
  0xf5   : > { %v554_v21 = vpack.c.bf16 %v528_v20, %v526_v19 }
  0xfc   : > { %v531_v22 = vpop.f32.mrf.mxu0 }
 0x104   : > { %v533_v23 = vpop.f32.mrf.mxu0 }
 0x105   : > { %v555_v33 = vpack.c.bf16 %v533_v23, %v531_v22 }
 0x10c   : > { %v536_v24 = vpop.f32.mrf.mxu0 }
 0x114   : > { %v538_v25 = vpop.f32.mrf.mxu0 }
 0x115   : > { %v556_v32 = vpack.c.bf16 %v538_v25, %v536_v24 }
 0x11c   : > { %v541_v26 = vpop.f32.mrf.mxu0 }
 0x124   : > { %v543_v27 = vpop.f32.mrf.mxu0 }
 0x125   : > { %v557_v31 = vpack.c.bf16 %v543_v27, %v541_v26 }
 0x12c   : > { %v546_v28 = vpop.f32.mrf.mxu0 }
 0x134   : > { %v548_v29 = vpop.f32.mrf.mxu0 }
 0x135   : > { %v558_v30 = vpack.c.bf16 %v548_v29, %v546_v28 }
 0x137   : > { %608 = vmatpush.bf16.msra.mxu1 %v558_v30 }
 0x13b   : > { %609 = vmatpush.bf16.msra.mxu1 %v557_v31 }
 0x13f   : > { %610 = vmatpush.bf16.msra.mxu1 %v556_v32 }
 0x143   : > { %611 = vmatpush.bf16.msra.mxu1 %v555_v33 }
 0x147   : > { %612 = vmatpush.bf16.msra.mxu1 %v554_v21 }
 0x14b   : > { %613 = vmatpush.bf16.msra.mxu1 %v553_v18 }
 0x14f   : > { %614 = vmatpush.bf16.msra.mxu1 %v552_v15 }
 0x153   : > { %615 = vmatpush.bf16.msra.mxu1 %v551_v12 }
 0x156   : > { %616 = vmatmul.bf16.vlgmr.msra.gmra.mxu1 %v1589_v34 }
 0x166   : > { %621 = vmatmul.bf16.gmra.mxu1 %v1592_v35 }
 0x176   : > { %626 = vmatmul.bf16.gmra.mxu1 %v1595_v36 }
 0x186   : > { %631 = vmatmul.bf16.gmra.mxu1 %v1598_v37 }
 0x196   : > { %636 = vmatmul.bf16.gmra.mxu1 %v1601_v38 }
 0x1a6   : > { %641 = vmatmul.bf16.gmra.mxu1 %v1604_v39 }
 0x1b6   : > { %646 = vmatmul.bf16.gmra.mxu1 %v1607_v40 }
 0x1c6   : > { %651 = vmatmul.bf16.gmra.mxu1 %v1610_v43 }
 0x1d3   : > { %v617_v44 = vpop.f32.mrf.mxu1 }
 0x1d4   : > { %v618_v46 = vadd.f32 %v1239_v45, %v617_v44 }
 0x1d6   : > { %v657_v49 = vmax.f32 %v618_v46, 0.0 }
 0x1db   : > { %v619_v47 = vpop.f32.mrf.mxu1 }
 0x1dc   : > { %v620_v48 = vadd.f32 %v1239_v45, %v619_v47 }
 0x1de   : > { %v658_v50 = vmax.f32 %v620_v48, 0.0 }
 0x1e0   : > { %v673_v51 = vpack.c.bf16 %v658_v50, %v657_v49 }
 0x1e2   : > { %1128 = vmatmul.msk.bf16.vlgmr.msra.gmra.mxu2 %vm697_vm2, %v673_v51 }
 0x1e3   : > { %v622_v52 = vpop.f32.mrf.mxu1 }
 0x1e4   : > { %v623_v53 = vadd.f32 %v1239_v45, %v622_v52 }
 0x1e6   : > { %v659_v56 = vmax.f32 %v623_v53, 0.0 }
 0x1eb   : > { %v624_v54 = vpop.f32.mrf.mxu1 }
 0x1ec   : > { %v625_v55 = vadd.f32 %v1239_v45, %v624_v54 }
 0x1ee   : > { %v660_v57 = vmax.f32 %v625_v55, 0.0 }
 0x1f0   : > { %v674_v58 = vpack.c.bf16 %v660_v57, %v659_v56 }
 0x1f2   : > { %1129 = vmatmul.msk.bf16.gmra.mxu2 %vm697_vm2, %v674_v58 }
 0x1f3   : > { %v627_v59 = vpop.f32.mrf.mxu1 }
 0x1f4   : > { %v628_v60 = vadd.f32 %v1239_v45, %v627_v59 }
 0x1f6   : > { %v661_v63 = vmax.f32 %v628_v60, 0.0 }
 0x1fb   : > { %v629_v61 = vpop.f32.mrf.mxu1 }
 0x1fc   : > { %v630_v62 = vadd.f32 %v1239_v45, %v629_v61 }
 0x1fe   : > { %v662_v0 = vmax.f32 %v630_v62, 0.0 }
 0x200   : > { %v675_v1 = vpack.c.bf16 %v662_v0, %v661_v63 }
 0x202   : > { %1130 = vmatmul.msk.bf16.gmra.mxu2 %vm697_vm2, %v675_v1 }
 0x203   : > { %v632_v2 = vpop.f32.mrf.mxu1 }
 0x204   : > { %v633_v3 = vadd.f32 %v1239_v45, %v632_v2 }
 0x206   : > { %v663_v6 = vmax.f32 %v633_v3, 0.0 }
 0x20b   : > { %v634_v4 = vpop.f32.mrf.mxu1 }
 0x20c   : > { %v635_v5 = vadd.f32 %v1239_v45, %v634_v4 }
 0x20e   : > { %v664_v7 = vmax.f32 %v635_v5, 0.0 }
 0x210   : > { %v676_v8 = vpack.c.bf16 %v664_v7, %v663_v6 }
 0x212   : > { %1131 = vmatmul.msk.bf16.gmra.mxu2 %vm697_vm2, %v676_v8 }
 0x213   : > { %v637_v9 = vpop.f32.mrf.mxu1 }
 0x214   : > { %v638_v10 = vadd.f32 %v1239_v45, %v637_v9 }
 0x216   : > { %v665_v13 = vmax.f32 %v638_v10, 0.0 }
 0x21b   : > { %v639_v11 = vpop.f32.mrf.mxu1 }
 0x21c   : > { %v640_v12 = vadd.f32 %v1239_v45, %v639_v11 }
 0x21e   : > { %v666_v14 = vmax.f32 %v640_v12, 0.0 }
 0x220   : > { %v677_v15 = vpack.c.bf16 %v666_v14, %v665_v13 }
 0x222   : > { %1132 = vmatmul.msk.bf16.gmra.mxu2 %vm697_vm2, %v677_v15 }
 0x223   : > { %v642_v16 = vpop.f32.mrf.mxu1 }
 0x224   : > { %v643_v17 = vadd.f32 %v1239_v45, %v642_v16 }
 0x226   : > { %v667_v20 = vmax.f32 %v643_v17, 0.0 }
 0x22b   : > { %v644_v18 = vpop.f32.mrf.mxu1 }
 0x22c   : > { %v645_v19 = vadd.f32 %v1239_v45, %v644_v18  ;;  %v1169_v18 = vld [vmem:[#allocation5 + $0x8] sm:$0xff] }
 0x22d   : > { %895 = vmatpush.bf16.msrb.mxu2 %v1169_v18 }
 0x22e   : > { %v668_v21 = vmax.f32 %v645_v19, 0.0 }
 0x230   : > { %v678_v22 = vpack.c.bf16 %v668_v21, %v667_v20  ;;  %v1168_v21 = vld [vmem:[#allocation5] sm:$0xff] }
 0x231   : > { %896 = vmatpush.bf16.msrb.mxu2 %v1168_v21 }
 0x232   : > { %1133 = vmatmul.msk.bf16.gmra.mxu2 %vm697_vm2, %v678_v22 }
 0x233   : > { %v647_v23 = vpop.f32.mrf.mxu1 }
 0x234   : > { %v648_v24 = vadd.f32 %v1239_v45, %v647_v23 }
 0x236   : > { %v669_v27 = vmax.f32 %v648_v24, 0.0 }
 0x23b   : > { %v649_v25 = vpop.f32.mrf.mxu1 }
 0x23c   : > { %v650_v26 = vadd.f32 %v1239_v45, %v649_v25 }
 0x23e   : > { %v670_v28 = vmax.f32 %v650_v26, 0.0 }
 0x240   : > { %v679_v29 = vpack.c.bf16 %v670_v28, %v669_v27 }
 0x242   : > { %1134 = vmatmul.msk.bf16.gmra.mxu2 %vm697_vm2, %v679_v29 }
 0x243   : > { %v652_v30 = vpop.f32.mrf.mxu1 }
 0x244   : > { %v653_v31 = vadd.f32 %v1239_v45, %v652_v30 }
 0x246   : > { %v671_v41 = vmax.f32 %v653_v31, 0.0 }
 0x24b   : > { %v654_v32 = vpop.f32.mrf.mxu1 }
 0x24c   : > { %v655_v33 = vadd.f32 %v1239_v45, %v654_v32 }
 0x24e   : > { %v672_v42 = vmax.f32 %v655_v33, 0.0 }
 0x250   : > { %v680_v44 = vpack.c.bf16 %v672_v42, %v671_v41 }
 0x252   : > { %1135 = vmatmul.msk.bf16.gmra.mxu2 %vm697_vm2, %v680_v44 }
 0x265   : > { %v731_v46 = vpop.f32.mrf.mxu2 }
 0x26d   : > { %v733_v47 = vpop.f32.mrf.mxu2 }
 0x26e   : > { %v771_v48 = vpack.c.bf16 %v733_v47, %v731_v46 }
 0x275   : > { %v736_v49 = vpop.f32.mrf.mxu2 }
 0x27d   : > { %v738_v50 = vpop.f32.mrf.mxu2 }
 0x27e   : > { %v772_v51 = vpack.c.bf16 %v738_v50, %v736_v49 }
 0x285   : > { %v741_v52 = vpop.f32.mrf.mxu2 }
 0x28d   : > { %v743_v53 = vpop.f32.mrf.mxu2 }
 0x28e   : > { %v773_v54 = vpack.c.bf16 %v743_v53, %v741_v52 }
 0x295   : > { %v746_v55 = vpop.f32.mrf.mxu2 }
 0x29d   : > { %v748_v56 = vpop.f32.mrf.mxu2 }
 0x29e   : > { %v774_v57 = vpack.c.bf16 %v748_v56, %v746_v55 }
 0x2a5   : > { %v751_v58 = vpop.f32.mrf.mxu2 }
 0x2ad   : > { %v753_v59 = vpop.f32.mrf.mxu2 }
 0x2ae   : > { %v775_v4 = vpack.c.bf16 %v753_v59, %v751_v58 }
 0x2b5   : > { %v756_v45 = vpop.f32.mrf.mxu2 }
 0x2bd   : > { %v758_v60 = vpop.f32.mrf.mxu2 }
 0x2be   : > { %v776_v3 = vpack.c.bf16 %v758_v60, %v756_v45  ;;  %v1241_v45 = vld [vmem:[%s1681_s6] ss:$0 sm:$0xff] }
 0x2c5   : > { %v761_v61 = vpop.f32.mrf.mxu2 }
 0x2cd   : > { %v763_v62 = vpop.f32.mrf.mxu2 }
 0x2ce   : > { %v777_v2 = vpack.c.bf16 %v763_v62, %v761_v61 }
 0x2d5   : > { %v766_v63 = vpop.f32.mrf.mxu2 }
 0x2dd   : > { %v768_v0 = vpop.f32.mrf.mxu2 }
 0x2de   : > { %v778_v1 = vpack.c.bf16 %v768_v0, %v766_v63 }
 0x2e0   : > { %780 = vmatpush.bf16.msra.mxu3 %v778_v1 }
 0x2e4   : > { %781 = vmatpush.bf16.msra.mxu3 %v777_v2 }
 0x2e8   : > { %782 = vmatpush.bf16.msra.mxu3 %v776_v3 }
 0x2ec   : > { %783 = vmatpush.bf16.msra.mxu3 %v775_v4 }
 0x2f0   : > { %784 = vmatpush.bf16.msra.mxu3 %v774_v57  ;;  %v845_v57 = vld [vmem:[%s341_s17] sm:$0xff]  ;;  %s918_s17 = sshll.u32 %s914_s18, 4  ;;  %s919_s17 = int_to_ptr.hbm [resolvable:$true] %s918_s17 }
 0x2f1   : > { %s1346_s12 = sshra.s32 %s919_s17, 4  ;;  %s1347_s12 = int_to_ptr.hbm [resolvable:$true] %s1346_s12 }
 0x2f2   : > { %s1348_s10 = scalar_lea.hbm %s1347_s12, 8  ;;  %p1353_p7 = scmp.lt.s32.totalorder %s1347_s12, %s1683_s8 }
 0x2f3   : > { %p1349_p12 = scmp.ne.s32.totalorder %s1347_s12, %s1348_s10  ;;  %p1354_p8 = scmp.lt.s32.totalorder %s1352_s13, %s1348_s10 }
 0x2f4   : > { %785 = vmatpush.bf16.msra.mxu3 %v773_v54 }
 0x2f5   : > { %p1350_p2 = pnand %p1349_p12, %p1512_p11  ;;  %p1355_p9 = por %p1354_p8, %p1353_p7 }
 0x2f7   : > { %p1351_p6 = pneg %p1350_p2 }
 0x2f8   : > { %786 = vmatpush.bf16.msra.mxu3 %v772_v51 }
 0x2f9   : > { %p1356_p10 = pnand %p1355_p9, %p1351_p6 }
 0x2fc   : > { %787 = vmatpush.bf16.msra.mxu3 %v771_v48 }
 0x2ff   : > { %788 = vmatmul.bf16.vlgmr.msra.gmra.mxu3 %v1589_v34 }
 0x30f   : > { %793 = vmatmul.bf16.gmra.mxu3 %v1592_v35 }
 0x31f   : > { %798 = vmatmul.bf16.gmra.mxu3 %v1595_v36 }
 0x32f   : > { %803 = vmatmul.bf16.gmra.mxu3 %v1598_v37 }
 0x33f   : > { %808 = vmatmul.bf16.gmra.mxu3 %v1601_v38 }
 0x34f   : > { %813 = vmatmul.bf16.gmra.mxu3 %v1604_v39  ;;  %v1240_v39 = vld [vmem:[%s1680_s5 + $0x1] ss:$0 sm:$0xff] }
 0x35f   : > { %818 = vmatmul.bf16.gmra.mxu3 %v1607_v40 }
 0x36f   : > { %823 = vmatmul.bf16.gmra.mxu3 %v1610_v43 }
 0x382   : > { %v789_v5 = vpop.f32.mrf.mxu3 }
 0x383   : > { %v790_v53 = vadd.f32 %v1240_v39, %v789_v5 }
 0x385   : > { %v829_v56 = vmax.f32 %v790_v53, 0.0 }
 0x38a   : > { %v791_v6 = vpop.f32.mrf.mxu3 }
 0x38b   : > { %v792_v51 = vadd.f32 %v1240_v39, %v791_v6 }
 0x38d   : > { %v830_v55 = vmax.f32 %v792_v51, 0.0 }
 0x392   : > { %v794_v7 = vpop.f32.mrf.mxu3 }
 0x393   : > { %v795_v49 = vadd.f32 %v1240_v39, %v794_v7 }
 0x395   : > { %v831_v54 = vmax.f32 %v795_v49, 0.0 }
 0x39a   : > { %v796_v8 = vpop.f32.mrf.mxu3 }
 0x39b   : > { %v797_v47 = vadd.f32 %v1240_v39, %v796_v8 }
 0x39d   : > { %v832_v52 = vmax.f32 %v797_v47, 0.0 }
 0x3a2   : > { %v799_v9 = vpop.f32.mrf.mxu3 }
 0x3a3   : > { %v800_v44 = vadd.f32 %v1240_v39, %v799_v9 }
 0x3a5   : > { %v833_v50 = vmax.f32 %v800_v44, 0.0 }
 0x3aa   : > { %v801_v34 = vpop.f32.mrf.mxu3 }
 0x3ab   : > { %v802_v41 = vadd.f32 %v1240_v39, %v801_v34 }
 0x3ad   : > { %v834_v48 = vmax.f32 %v802_v41, 0.0 }
 0x3b2   : > { %v804_v10 = vpop.f32.mrf.mxu3 }
 0x3b3   : > { %v805_v32 = vadd.f32 %v1240_v39, %v804_v10 }
 0x3b5   : > { %v835_v46 = vmax.f32 %v805_v32, 0.0 }
 0x3ba   : > { %v806_v35 = vpop.f32.mrf.mxu3 }
 0x3bb   : > { %v807_v30 = vadd.f32 %v1240_v39, %v806_v35 }
 0x3bd   : > { %v836_v42 = vmax.f32 %v807_v30, 0.0 }
 0x3c2   : > { %v809_v11 = vpop.f32.mrf.mxu3 }
 0x3c3   : > { %v810_v28 = vadd.f32 %v1240_v39, %v809_v11 }
 0x3c5   : > { %v837_v33 = vmax.f32 %v810_v28, 0.0 }
 0x3ca   : > { %v811_v36 = vpop.f32.mrf.mxu3 }
 0x3cb   : > { %v812_v26 = vadd.f32 %v1240_v39, %v811_v36 }
 0x3cd   : > { %v838_v31 = vmax.f32 %v812_v26, 0.0 }
 0x3d2   : > { %v814_v12 = vpop.f32.mrf.mxu3 }
 0x3d3   : > { %v815_v24 = vadd.f32 %v1240_v39, %v814_v12 }
 0x3d5   : > { %v839_v29 = vmax.f32 %v815_v24, 0.0 }
 0x3da   : > { %v816_v37 = vpop.f32.mrf.mxu3 }
 0x3db   : > { %v817_v22 = vadd.f32 %v1240_v39, %v816_v37 }
 0x3dd   : > { %v840_v27 = vmax.f32 %v817_v22, 0.0 }
 0x3e2   : > { %v819_v13 = vpop.f32.mrf.mxu3 }
 0x3e3   : > { %v820_v19 = vadd.f32 %v1240_v39, %v819_v13 }
 0x3e5   : > { %v841_v25 = vmax.f32 %v820_v19, 0.0 }
 0x3ea   : > { %v821_v38 = vpop.f32.mrf.mxu3 }
 0x3eb   : > { %v822_v16 = vadd.f32 %v1240_v39, %v821_v38 }
 0x3ed   : > { %v842_v23 = vmax.f32 %v822_v16, 0.0 }
 0x3f2   : > { %v824_v14 = vpop.f32.mrf.mxu3 }
 0x3f3   : > { %v825_v43 = vadd.f32 %v1240_v39, %v824_v14 }
 0x3f5   : > { %v843_v20 = vmax.f32 %v825_v43, 0.0 }
 0x3fa   : > { %v826_v40 = vpop.f32.mrf.mxu3 }
 0x3fb   : > { %v827_v15 = vadd.f32 %v1240_v39, %v826_v40 }
 0x3fd   : > { %v844_v17 = vmax.f32 %v827_v15, 0.0 }
 0x3ff   : > { %846 = vmatpush.msrb.mxu0 %v844_v17 }
 0x401   : > { %847 = vmatpush.msrb.mxu0 %v843_v20 }
 0x403   : > { %848 = vmatpush.msrb.mxu0 %v842_v23 }
 0x405   : > { %849 = vmatpush.msrb.mxu0 %v841_v25 }
 0x407   : > { %850 = vmatpush.msrb.mxu0 %v840_v27 }
 0x409   : > { %851 = vmatpush.msrb.mxu0 %v839_v29 }
 0x40b   : > { %852 = vmatpush.msrb.mxu0 %v838_v31 }
 0x40d   : > { %853 = vmatpush.msrb.mxu0 %v837_v33 }
 0x40f   : > { %854 = vmatpush.msrb.mxu0 %v836_v42 }
 0x411   : > { %855 = vmatpush.msrb.mxu0 %v835_v46 }
 0x413   : > { %856 = vmatpush.msrb.mxu0 %v834_v48 }
 0x415   : > { %857 = vmatpush.msrb.mxu0 %v833_v50 }
 0x417   : > { %858 = vmatpush.msrb.mxu0 %v832_v52 }
 0x419   : > { %859 = vmatpush.msrb.mxu0 %v831_v54 }
 0x41b   : > { %860 = vmatpush.msrb.mxu0 %v830_v55 }
 0x41d   : > { %861 = vmatpush.msrb.mxu0 %v829_v56 }
 0x41e   : > { %862 = vmatmul.f32.vlgmr.msrb.gmra.mxu0 %v845_v57 }
 0x49b   : > { %v863_v58 = vpop.f32.mrf.mxu0 }
 0x49c   : > { %v866_v59 = vpack.c.bf16 %v863_v58, %v863_v58 }
 0x49e   : > { %1144 = vmatmul.msk.bf16.vlgmr.msrb.gmra.mxu2 %vm697_vm2, %v866_v59 }
 0x521   : > { %v898_v60 = vpop.f32.mrf.mxu2 }
 0x522   : > { %v899_v61 = vadd.f32 %v1241_v45, %v898_v60 }
 0x524   : > { %902 = vst [vmem:[%s384_s21] sm:$0xff] %v899_v61 }
 0x525   : > { %1359 = shalt.err (!%p1356_p10)
}
 0x526   : > { %1180 = dma.vmem_to_hbm [thread:$0]  (%p1512_p11), %s917_s14, 128, %s919_s17, %s904_s3  }
 0x529   : > { %v900_v62 = vpop.f32.mrf.mxu2 }
 0x52a PF: > { %p1202_p13 = scmp.ge.s32.totalorder %s1406_s30, 2  ;;  %s930_s4 = sand.u32 1, %s1394_s27  }
 0x52b   : > { %s931_s15 = scalar_lea.sflag [#allocation4], %s930_s4 }
 0x52c   : > { %p1194_p0 = pnand %p1202_p13, %p1531_p5 }
 0x52e   : > { %p1195_p3 = pneg %p1194_p0 }
 0x530   : > { %1389 = dma.done.wait (%p1195_p3), %s931_s15, 128  }
 0x531   : > { %1391 = vsyncadd (%p1195_p3), %s931_s15, 4294967168  ;;  %s1695_s19 = sld [smem:[#allocation13_spill]]  ;;  %p20_p1 = scmp.ge.s32.totalorder %s1500_s24, 6  }
 0x532   : > { %s1696_s27 = smov %s1398_s28  ;;  %s1697_s28 = smov %s1402_s29 }
 0x533   : > { %s1699_s30 = smov %s1500_s24  ;;  %22 = sbr.rel (!%p20_p1) target bundleno = 8 (0x8), region = 110 }
 0x537   : > { %s1698_s29 = smov %s1695_s19 }
 0x538   :  { %937 = vsyncpa [#allocation3], 1 }
 0x539   :  { %939 = vsyncpa [#allocation3 + $0x1], 1 }
 0x53a   :  { %940 = vsyncpa [#allocation6], 1 }
 0x53b   :  { %941 = vsyncpa [#allocation4], 1 }
 0x53c   :  { %943 = vsyncpa [#allocation4 + $0x1], 1 }

</bundles_post_ra>
